<compile_context>
chip_gen: v6e
topology: v6e:2x2x1
jax: 0.10.0
libtpu: 0.0.40
codegen_flags: <defaults>
</compile_context>

<pallas_src>
import functools

import jax
import jax.numpy as jnp
from jax.experimental import pallas as pl
from jax.experimental.pallas import tpu as pltpu

BN_EPS = 1e-5


# ---------------------------------------------------------------------------
# Pass 1: stats only.  conv + bias + ReLU for this batch-block, emit per-block
#         per-channel mean and centered sum-of-squares (numerically stable).
# ---------------------------------------------------------------------------
def _conv_relu_stats_kernel(x_ref, w_ref, b_ref, mean_ref, m2_ref,
                            *, nb, kernel_size, stride, l_out):
    n_phase = min(stride, kernel_size)
    c_out = w_ref.shape[1]
    wk = [w_ref[k] for k in range(kernel_size)]            # each (C_out, C_in)
    bcol = b_ref[...]                                       # (C_out, 1)

    ys = []
    s = jnp.zeros((c_out, 1), jnp.float32)
    for b in range(nb):                                     # static, unrolled
        rows = [x_ref[b, p, :, :] for p in range(n_phase)]  # each (C_in, W)
        acc = jnp.zeros((c_out, l_out), jnp.float32)
        for k in range(kernel_size):                        # static, unrolled
            p, q = k % stride, k // stride
            acc = acc + jnp.dot(wk[k], rows[p][:, q:q + l_out],
                                preferred_element_type=jnp.float32)
        yb = jnp.maximum(acc + bcol, 0.0)
        ys.append(yb)
        s = s + jnp.sum(yb, axis=-1, keepdims=True)

    mean_blk = s * (1.0 / float(nb * l_out))
    m2 = jnp.zeros((c_out, 1), jnp.float32)
    for yb in ys:
        d = yb - mean_blk
        m2 = m2 + jnp.sum(d * d, axis=-1, keepdims=True)

    mean_ref[0] = mean_blk
    m2_ref[0] = m2


# ---------------------------------------------------------------------------
# Pass 2: recompute conv + bias + ReLU and apply (y - mean) * inv_std.
# ---------------------------------------------------------------------------
def _conv_relu_norm_kernel(x_ref, w_ref, b_ref, mean_ref, inv_ref, o_ref,
                           *, nb, kernel_size, stride, l_out):
    n_phase = min(stride, kernel_size)
    c_out = w_ref.shape[1]
    wk = [w_ref[k] for k in range(kernel_size)]
    bcol = b_ref[...]
    mean = mean_ref[...]
    inv = inv_ref[...]

    for b in range(nb):
        rows = [x_ref[b, p, :, :] for p in range(n_phase)]
        acc = jnp.zeros((c_out, l_out), jnp.float32)
        for k in range(kernel_size):
            p, q = k % stride, k // stride
            acc = acc + jnp.dot(wk[k], rows[p][:, q:q + l_out],
                                preferred_element_type=jnp.float32)
        yb = jnp.maximum(acc + bcol, 0.0)
        o_ref[b] = ((yb - mean) * inv).astype(o_ref.dtype)


# ---------------------------------------------------------------------------
# Wrapper helpers.
# ---------------------------------------------------------------------------
def _phase_view(x, kernel_size, stride, l_out):
    """(N, C_in, L) -> (N, n_phase, C_in, n_cols), copies (never gather).

    x_ph[n, p, c, t] = x[n, c, t*stride + p].  For stride == 1 it is a free reshape.
    """
    n, c_in, l = x.shape
    n_phase = min(stride, kernel_size)
    halo = (kernel_size - 1) // stride
    n_cols = l_out + halo
    if stride == 1:
        return x.reshape(n, 1, c_in, l), n_phase, n_cols       # n_cols == l
    l_req = n_cols * stride
    if l_req > l:
        x = jnp.pad(x, ((0, 0), (0, 0), (0, l_req - l)))
    x_ph = x[:, :, :l_req].reshape(n, c_in, n_cols, stride)
    x_ph = jnp.transpose(x_ph, (0, 3, 1, 2))[:, :n_phase]
    return x_ph, n_phase, n_cols


def _pick_nb(n, row_bytes, target_bytes=4 << 20):
    """Largest divisor of n keeping a block under target, preferring >=2 grid steps."""
    divisors = [d for d in range(1, n + 1) if n % d == 0]
    fit = [d for d in divisors if d * row_bytes <= target_bytes]
    nb = max(fit) if fit else 1
    if n // nb < 2:
        smaller = [d for d in divisors if d < nb and n // d >= 2]
        if smaller:
            nb = max(smaller)
    return nb


def _pick_vmem_limit():
    cap = 128 << 20
    try:
        info = pltpu.get_tpu_info()
        cap = int(getattr(info, "vmem_capacity_bytes", cap) or cap)
    except Exception:
        pass
    # Leave headroom for Mosaic-internal scratch; ~48 MiB on v7x, up to 100 MiB on v5e/v6e.
    return int(max(32 << 20, min(cap - (16 << 20), 100 << 20)))


def relu_renorm_layer(x, weight, bias, *, kernel_size, stride):
    """Forward pass of ReluRenormLayer.

    x      : (N, C_in, L)       float32 (PyTorch Conv1d NCL layout)
    weight : (C_out, C_in, K)   float32 (PyTorch Conv1d weight layout)
    bias   : (C_out,)           float32
    returns: (N, C_out, L_out)  float32
    """
    n, c_in, l = x.shape
    c_out = weight.shape[0]
    l_out = (l - kernel_size) // stride + 1
    assert l_out > 0

    x_ph, n_phase, n_cols = _phase_view(x, kernel_size, stride, l_out)
    w_k = jnp.transpose(weight, (2, 0, 1))                      # (K, C_out, C_in)
    b_col = bias.reshape(c_out, 1)

    row_bytes = 4 * (n_phase * c_in * n_cols + c_out * l_out)
    nb = _pick_nb(n, row_bytes)
    n_blocks = n // nb
    grid = (n_blocks,)
    vmem_limit = _pick_vmem_limit()

    x_spec = pl.BlockSpec((nb, n_phase, c_in, n_cols), lambda i: (i, 0, 0, 0))
    w_spec = pl.BlockSpec((kernel_size, c_out, c_in), lambda i: (0, 0, 0))
    b_spec = pl.BlockSpec((c_out, 1), lambda i: (0, 0))
    stat_spec = pl.BlockSpec((1, c_out, 1), lambda i: (i, 0, 0))

    conv_flops = 2 * n * l_out * c_in * kernel_size * c_out

    # ---- Pass 1: per-block mean / centered M2 (fully parallel grid). ----
    kern1 = functools.partial(_conv_relu_stats_kernel, nb=nb,
                              kernel_size=kernel_size, stride=stride, l_out=l_out)
    mean_blk, m2_blk = pl.pallas_call(
        kern1,
        grid=grid,
        in_specs=[x_spec, w_spec, b_spec],
        out_specs=[stat_spec, stat_spec],
        out_shape=[jax.ShapeDtypeStruct((n_blocks, c_out, 1), jnp.float32),
                   jax.ShapeDtypeStruct((n_blocks, c_out, 1), jnp.float32)],
        compiler_params=pltpu.CompilerParams(
            dimension_semantics=("parallel",), vmem_limit_bytes=vmem_limit),
        cost_estimate=pl.CostEstimate(
            flops=conv_flops + 4 * n * c_out * l_out, transcendentals=0,
            bytes_accessed=4 * (x_ph.size + w_k.size + c_out + 2 * n_blocks * c_out)),
    )(x_ph, w_k, b_col)

    # ---- Merge equal-count block statistics in XLA (tiny, numerically stable). ----
    m_blk = jnp.float32(nb * l_out)
    m_total = jnp.float32(n * l_out)
    mean = jnp.mean(mean_blk, axis=0)                           # (C_out, 1)
    between = jnp.sum((mean_blk - mean) ** 2, axis=0)           # (C_out, 1)
    var = jnp.maximum((jnp.sum(m2_blk, axis=0) + m_blk * between) / m_total, 0.0)
    inv_std = 1.0 / jnp.sqrt(var + BN_EPS)

    # ---- Pass 2: recompute conv + ReLU, fused normalize epilogue. ----
    kern2 = functools.partial(_conv_relu_norm_kernel, nb=nb,
                              kernel_size=kernel_size, stride=stride, l_out=l_out)
    out = pl.pallas_call(
        kern2,
        grid=grid,
        in_specs=[x_spec, w_spec, b_spec,
                  pl.BlockSpec((c_out, 1), lambda i: (0, 0)),
                  pl.BlockSpec((c_out, 1), lambda i: (0, 0))],
        out_specs=pl.BlockSpec((nb, c_out, l_out), lambda i: (i, 0, 0)),
        out_shape=jax.ShapeDtypeStruct((n, c_out, l_out), jnp.float32),
        compiler_params=pltpu.CompilerParams(
            dimension_semantics=("parallel",), vmem_limit_bytes=vmem_limit),
        cost_estimate=pl.CostEstimate(
            flops=conv_flops + 4 * n * c_out * l_out, transcendentals=0,
            bytes_accessed=4 * (x_ph.size + n * c_out * l_out + w_k.size + 3 * c_out)),
    )(x_ph, w_k, b_col, mean, inv_std)

    return out


def _reference(x, weight, bias, *, kernel_size, stride):
    """Pure-JAX reference: conv1d + relu + batchnorm1d(training, affine=False)."""
    y = jax.lax.conv_general_dilated(
        x, weight, window_strides=(stride,), padding="VALID",
        dimension_numbers=("NCH", "OIH", "NCH"))
    y = y + bias[None, :, None]
    y = jnp.maximum(y, 0.0)
    mean = jnp.mean(y, axis=(0, 2), keepdims=True)
    var = jnp.mean((y - mean) ** 2, axis=(0, 2), keepdims=True)
    return (y - mean) / jnp.sqrt(var + BN_EPS)


if __name__ == "__main__":
    input_dim, output_dim = 4, 8
    kernel_size, stride = 3, 2
    batch, length = 2, 16

    key = jax.random.PRNGKey(0)
    kx, kw, kb = jax.random.split(key, 3)

    x = jax.random.normal(kx, (batch, input_dim, length), dtype=jnp.float32)
    fan_in = input_dim * kernel_size
    bound = 1.0 / (fan_in ** 0.5)
    weight = jax.random.uniform(kw, (output_dim, input_dim, kernel_size),
                                minval=-bound, maxval=bound, dtype=jnp.float32)
    bias = jax.random.uniform(kb, (output_dim,), minval=-bound, maxval=bound,
                              dtype=jnp.float32)

    # Main config: kernel_size=3, stride=2 (exercises the phase de-interleave path).
    fwd = jax.jit(functools.partial(relu_renorm_layer,
                                    kernel_size=kernel_size, stride=stride))
    out = jax.block_until_ready(fwd(x, weight, bias))
    ref = _reference(x, weight, bias, kernel_size=kernel_size, stride=stride)
    l_out = (length - kernel_size) // stride + 1
    assert out.shape == ref.shape == (batch, output_dim, l_out)
    assert jnp.allclose(out, ref, atol=1e-4, rtol=1e-4), \
        float(jnp.max(jnp.abs(out - ref)))

    # stride == 1 path (zero-copy input feed).
    fwd1 = jax.jit(functools.partial(relu_renorm_layer, kernel_size=3, stride=1))
    out1 = jax.block_until_ready(fwd1(x, weight, bias))
    ref1 = _reference(x, weight, bias, kernel_size=3, stride=1)
    assert out1.shape == ref1.shape
    assert jnp.allclose(out1, ref1, atol=1e-4, rtol=1e-4), \
        float(jnp.max(jnp.abs(out1 - ref1)))

    print("KERNEL_OK")
</pallas_src>

<mosaic_0001>
module attributes {stable_mosaic.version = 11 : i64} {
  func.func @_conv_relu_norm_kernel(%arg0: i32, %arg1: memref<1x2x4x8xf32, #tpu.memory_space<vmem>>, %arg2: memref<3x8x4xf32, #tpu.memory_space<vmem>>, %arg3: memref<8x1xf32, #tpu.memory_space<vmem>>, %arg4: memref<8x1xf32, #tpu.memory_space<vmem>>, %arg5: memref<8x1xf32, #tpu.memory_space<vmem>>, %arg6: memref<1x8x7xf32, #tpu.memory_space<vmem>>) attributes {dimension_semantics = [#tpu.dimension_semantics<parallel>], iteration_bounds = array<i64: 2>, scalar_prefetch = 0 : i64, scratch_operands = 0 : i64, tpu.core_type = #tpu.core_type<tc>, window_params = [{transform_indices = @transform_0, window_bounds = array<i64: 1, 2, 4, 8>}, {pipeline_mode = #tpu.pipeline_mode<synchronous>, transform_indices = @transform_1, window_bounds = array<i64: 3, 8, 4>}, {pipeline_mode = #tpu.pipeline_mode<synchronous>, transform_indices = @transform_2, window_bounds = array<i64: 8, 1>}, {pipeline_mode = #tpu.pipeline_mode<synchronous>, transform_indices = @transform_3, window_bounds = array<i64: 8, 1>}, {pipeline_mode = #tpu.pipeline_mode<synchronous>, transform_indices = @transform_4, window_bounds = array<i64: 8, 1>}, {transform_indices = @transform_5, window_bounds = array<i64: 1, 8, 7>}]} {
    %c0 = arith.constant 0 : index
    %c0_0 = arith.constant 0 : index
    %c0_1 = arith.constant 0 : index
    %0 = vector.load %arg2[%c0, %c0_0, %c0_1] : memref<3x8x4xf32, #tpu.memory_space<vmem>>, vector<1x8x4xf32>
    %1 = vector.shape_cast %0 : vector<1x8x4xf32> to vector<8x4xf32>
    %c1 = arith.constant 1 : index
    %c0_2 = arith.constant 0 : index
    %c0_3 = arith.constant 0 : index
    %2 = vector.load %arg2[%c1, %c0_2, %c0_3] : memref<3x8x4xf32, #tpu.memory_space<vmem>>, vector<1x8x4xf32>
    %3 = vector.shape_cast %2 : vector<1x8x4xf32> to vector<8x4xf32>
    %c2 = arith.constant 2 : index
    %c0_4 = arith.constant 0 : index
    %c0_5 = arith.constant 0 : index
    %4 = vector.load %arg2[%c2, %c0_4, %c0_5] : memref<3x8x4xf32, #tpu.memory_space<vmem>>, vector<1x8x4xf32>
    %5 = vector.shape_cast %4 : vector<1x8x4xf32> to vector<8x4xf32>
    %c0_6 = arith.constant 0 : index
    %c0_7 = arith.constant 0 : index
    %6 = vector.load %arg3[%c0_6, %c0_7] : memref<8x1xf32, #tpu.memory_space<vmem>>, vector<8x1xf32>
    %c0_8 = arith.constant 0 : index
    %c0_9 = arith.constant 0 : index
    %7 = vector.load %arg4[%c0_8, %c0_9] : memref<8x1xf32, #tpu.memory_space<vmem>>, vector<8x1xf32>
    %c0_10 = arith.constant 0 : index
    %c0_11 = arith.constant 0 : index
    %8 = vector.load %arg5[%c0_10, %c0_11] : memref<8x1xf32, #tpu.memory_space<vmem>>, vector<8x1xf32>
    %c0_12 = arith.constant 0 : index
    %c0_13 = arith.constant 0 : index
    %c0_14 = arith.constant 0 : index
    %c0_15 = arith.constant 0 : index
    %9 = vector.load %arg1[%c0_12, %c0_13, %c0_14, %c0_15] : memref<1x2x4x8xf32, #tpu.memory_space<vmem>>, vector<1x1x4x8xf32>
    %10 = vector.shape_cast %9 : vector<1x1x4x8xf32> to vector<4x8xf32>
    %c0_16 = arith.constant 0 : index
    %c1_17 = arith.constant 1 : index
    %c0_18 = arith.constant 0 : index
    %c0_19 = arith.constant 0 : index
    %11 = vector.load %arg1[%c0_16, %c1_17, %c0_18, %c0_19] : memref<1x2x4x8xf32, #tpu.memory_space<vmem>>, vector<1x1x4x8xf32>
    %12 = vector.shape_cast %11 : vector<1x1x4x8xf32> to vector<4x8xf32>
    %cst = arith.constant 0.000000e+00 : f32
    %13 = vector.broadcast %cst : f32 to vector<8x7xf32>
    %14 = vector.extract_strided_slice %10 {offsets = [0, 0], sizes = [4, 7], strides = [1, 1]} : vector<4x8xf32> to vector<4x7xf32>
    %cst_20 = arith.constant dense<0.000000e+00> : vector<8x7xf32>
    %15 = tpu.matmul %1, %14, %cst_20 {dimension_numbers = #tpu.dot_dimension_numbers<[1], [0], [0], [1], [0, 0, 1, 1], [], []>} : vector<8x4xf32>, vector<4x7xf32>, vector<8x7xf32> -> vector<8x7xf32>
    %16 = arith.addf %13, %15 : vector<8x7xf32>
    %17 = vector.extract_strided_slice %12 {offsets = [0, 0], sizes = [4, 7], strides = [1, 1]} : vector<4x8xf32> to vector<4x7xf32>
    %cst_21 = arith.constant dense<0.000000e+00> : vector<8x7xf32>
    %18 = tpu.matmul %3, %17, %cst_21 {dimension_numbers = #tpu.dot_dimension_numbers<[1], [0], [0], [1], [0, 0, 1, 1], [], []>} : vector<8x4xf32>, vector<4x7xf32>, vector<8x7xf32> -> vector<8x7xf32>
    %19 = arith.addf %16, %18 : vector<8x7xf32>
    %20 = vector.extract_strided_slice %10 {offsets = [0, 1], sizes = [4, 7], strides = [1, 1]} : vector<4x8xf32> to vector<4x7xf32>
    %cst_22 = arith.constant dense<0.000000e+00> : vector<8x7xf32>
    %21 = tpu.matmul %5, %20, %cst_22 {dimension_numbers = #tpu.dot_dimension_numbers<[1], [0], [0], [1], [0, 0, 1, 1], [], []>} : vector<8x4xf32>, vector<4x7xf32>, vector<8x7xf32> -> vector<8x7xf32>
    %22 = arith.addf %19, %21 : vector<8x7xf32>
    %23 = vector.broadcast %6 : vector<8x1xf32> to vector<8x7xf32>
    %24 = arith.addf %22, %23 : vector<8x7xf32>
    %cst_23 = arith.constant 0.000000e+00 : f32
    %25 = vector.broadcast %cst_23 : f32 to vector<8x7xf32>
    %26 = arith.maximumf %24, %25 : vector<8x7xf32>
    %27 = vector.broadcast %7 : vector<8x1xf32> to vector<8x7xf32>
    %28 = arith.subf %26, %27 : vector<8x7xf32>
    %29 = vector.broadcast %8 : vector<8x1xf32> to vector<8x7xf32>
    %30 = arith.mulf %28, %29 : vector<8x7xf32>
    %c0_24 = arith.constant 0 : index
    %c0_25 = arith.constant 0 : index
    %c0_26 = arith.constant 0 : index
    %31 = vector.load %arg6[%c0_24, %c0_25, %c0_26] : memref<1x8x7xf32, #tpu.memory_space<vmem>>, vector<1x8x7xf32>
    %32 = vector.shape_cast %31 : vector<1x8x7xf32> to vector<8x7xf32>
    %33 = vector.shape_cast %30 : vector<8x7xf32> to vector<1x8x7xf32>
    tpu.vector_store %arg6[%c0_24, %c0_25, %c0_26], %33 {strides = array<i32>} : memref<1x8x7xf32, #tpu.memory_space<vmem>>, vector<1x8x7xf32>,
    return
  }
  func.func @transform_0(%arg0: i32) -> (i32, i32, i32, i32) {
    %c0_i32 = arith.constant 0 : i32
    %c0_i32_0 = arith.constant 0 : i32
    %c0_i32_1 = arith.constant 0 : i32
    %c0_i32_2 = arith.constant 0 : i32
    return %arg0, %c0_i32, %c0_i32_0, %c0_i32_1 : i32, i32, i32, i32
  }
  func.func @transform_1(%arg0: i32) -> (i32, i32, i32) {
    %c0_i32 = arith.constant 0 : i32
    %c0_i32_0 = arith.constant 0 : i32
    %c0_i32_1 = arith.constant 0 : i32
    %c0_i32_2 = arith.constant 0 : i32
    return %c0_i32, %c0_i32_0, %c0_i32_1 : i32, i32, i32
  }
  func.func @transform_2(%arg0: i32) -> (i32, i32) {
    %c0_i32 = arith.constant 0 : i32
    %c0_i32_0 = arith.constant 0 : i32
    %c0_i32_1 = arith.constant 0 : i32
    return %c0_i32, %c0_i32_0 : i32, i32
  }
  func.func @transform_3(%arg0: i32) -> (i32, i32) {
    %c0_i32 = arith.constant 0 : i32
    %c0_i32_0 = arith.constant 0 : i32
    %c0_i32_1 = arith.constant 0 : i32
    return %c0_i32, %c0_i32_0 : i32, i32
  }
  func.func @transform_4(%arg0: i32) -> (i32, i32) {
    %c0_i32 = arith.constant 0 : i32
    %c0_i32_0 = arith.constant 0 : i32
    %c0_i32_1 = arith.constant 0 : i32
    return %c0_i32, %c0_i32_0 : i32, i32
  }
  func.func @transform_5(%arg0: i32) -> (i32, i32, i32) {
    %c0_i32 = arith.constant 0 : i32
    %c0_i32_0 = arith.constant 0 : i32
    %c0_i32_1 = arith.constant 0 : i32
    return %arg0, %c0_i32, %c0_i32_0 : i32, i32, i32
  }
}

module attributes {stable_mosaic.version = 11 : i64} {
  func.func @_conv_relu_stats_kernel(%arg0: i32, %arg1: memref<1x2x4x8xf32, #tpu.memory_space<vmem>>, %arg2: memref<3x8x4xf32, #tpu.memory_space<vmem>>, %arg3: memref<8x1xf32, #tpu.memory_space<vmem>>, %arg4: memref<1x8x1xf32, #tpu.memory_space<vmem>>, %arg5: memref<1x8x1xf32, #tpu.memory_space<vmem>>) attributes {dimension_semantics = [#tpu.dimension_semantics<parallel>], iteration_bounds = array<i64: 2>, scalar_prefetch = 0 : i64, scratch_operands = 0 : i64, tpu.core_type = #tpu.core_type<tc>, window_params = [{transform_indices = @transform_0, window_bounds = array<i64: 1, 2, 4, 8>}, {pipeline_mode = #tpu.pipeline_mode<synchronous>, transform_indices = @transform_1, window_bounds = array<i64: 3, 8, 4>}, {pipeline_mode = #tpu.pipeline_mode<synchronous>, transform_indices = @transform_2, window_bounds = array<i64: 8, 1>}, {transform_indices = @transform_3, window_bounds = array<i64: 1, 8, 1>}, {transform_indices = @transform_4, window_bounds = array<i64: 1, 8, 1>}]} {
    %c0 = arith.constant 0 : index
    %c0_0 = arith.constant 0 : index
    %c0_1 = arith.constant 0 : index
    %0 = vector.load %arg2[%c0, %c0_0, %c0_1] : memref<3x8x4xf32, #tpu.memory_space<vmem>>, vector<1x8x4xf32>
    %1 = vector.shape_cast %0 : vector<1x8x4xf32> to vector<8x4xf32>
    %c1 = arith.constant 1 : index
    %c0_2 = arith.constant 0 : index
    %c0_3 = arith.constant 0 : index
    %2 = vector.load %arg2[%c1, %c0_2, %c0_3] : memref<3x8x4xf32, #tpu.memory_space<vmem>>, vector<1x8x4xf32>
    %3 = vector.shape_cast %2 : vector<1x8x4xf32> to vector<8x4xf32>
    %c2 = arith.constant 2 : index
    %c0_4 = arith.constant 0 : index
    %c0_5 = arith.constant 0 : index
    %4 = vector.load %arg2[%c2, %c0_4, %c0_5] : memref<3x8x4xf32, #tpu.memory_space<vmem>>, vector<1x8x4xf32>
    %5 = vector.shape_cast %4 : vector<1x8x4xf32> to vector<8x4xf32>
    %c0_6 = arith.constant 0 : index
    %c0_7 = arith.constant 0 : index
    %6 = vector.load %arg3[%c0_6, %c0_7] : memref<8x1xf32, #tpu.memory_space<vmem>>, vector<8x1xf32>
    %cst = arith.constant 0.000000e+00 : f32
    %7 = vector.broadcast %cst : f32 to vector<8x1xf32>
    %c0_8 = arith.constant 0 : index
    %c0_9 = arith.constant 0 : index
    %c0_10 = arith.constant 0 : index
    %c0_11 = arith.constant 0 : index
    %8 = vector.load %arg1[%c0_8, %c0_9, %c0_10, %c0_11] : memref<1x2x4x8xf32, #tpu.memory_space<vmem>>, vector<1x1x4x8xf32>
    %9 = vector.shape_cast %8 : vector<1x1x4x8xf32> to vector<4x8xf32>
    %c0_12 = arith.constant 0 : index
    %c1_13 = arith.constant 1 : index
    %c0_14 = arith.constant 0 : index
    %c0_15 = arith.constant 0 : index
    %10 = vector.load %arg1[%c0_12, %c1_13, %c0_14, %c0_15] : memref<1x2x4x8xf32, #tpu.memory_space<vmem>>, vector<1x1x4x8xf32>
    %11 = vector.shape_cast %10 : vector<1x1x4x8xf32> to vector<4x8xf32>
    %cst_16 = arith.constant 0.000000e+00 : f32
    %12 = vector.broadcast %cst_16 : f32 to vector<8x7xf32>
    %13 = vector.extract_strided_slice %9 {offsets = [0, 0], sizes = [4, 7], strides = [1, 1]} : vector<4x8xf32> to vector<4x7xf32>
    %cst_17 = arith.constant dense<0.000000e+00> : vector<8x7xf32>
    %14 = tpu.matmul %1, %13, %cst_17 {dimension_numbers = #tpu.dot_dimension_numbers<[1], [0], [0], [1], [0, 0, 1, 1], [], []>} : vector<8x4xf32>, vector<4x7xf32>, vector<8x7xf32> -> vector<8x7xf32>
    %15 = arith.addf %12, %14 : vector<8x7xf32>
    %16 = vector.extract_strided_slice %11 {offsets = [0, 0], sizes = [4, 7], strides = [1, 1]} : vector<4x8xf32> to vector<4x7xf32>
    %cst_18 = arith.constant dense<0.000000e+00> : vector<8x7xf32>
    %17 = tpu.matmul %3, %16, %cst_18 {dimension_numbers = #tpu.dot_dimension_numbers<[1], [0], [0], [1], [0, 0, 1, 1], [], []>} : vector<8x4xf32>, vector<4x7xf32>, vector<8x7xf32> -> vector<8x7xf32>
    %18 = arith.addf %15, %17 : vector<8x7xf32>
    %19 = vector.extract_strided_slice %9 {offsets = [0, 1], sizes = [4, 7], strides = [1, 1]} : vector<4x8xf32> to vector<4x7xf32>
    %cst_19 = arith.constant dense<0.000000e+00> : vector<8x7xf32>
    %20 = tpu.matmul %5, %19, %cst_19 {dimension_numbers = #tpu.dot_dimension_numbers<[1], [0], [0], [1], [0, 0, 1, 1], [], []>} : vector<8x4xf32>, vector<4x7xf32>, vector<8x7xf32> -> vector<8x7xf32>
    %21 = arith.addf %18, %20 : vector<8x7xf32>
    %22 = vector.broadcast %6 : vector<8x1xf32> to vector<8x7xf32>
    %23 = arith.addf %21, %22 : vector<8x7xf32>
    %cst_20 = arith.constant 0.000000e+00 : f32
    %24 = vector.broadcast %cst_20 : f32 to vector<8x7xf32>
    %25 = arith.maximumf %23, %24 : vector<8x7xf32>
    %cst_21 = arith.constant dense<0.000000e+00> : vector<8xf32>
    %26 = vector.multi_reduction <add>, %25, %cst_21 [1] : vector<8x7xf32> to vector<8xf32>
    %27 = vector.shape_cast %26 : vector<8xf32> to vector<8x1xf32>
    %28 = arith.addf %7, %27 : vector<8x1xf32>
    %cst_22 = arith.constant 0.142857149 : f32
    %29 = vector.broadcast %cst_22 : f32 to vector<8x1xf32>
    %30 = arith.mulf %28, %29 : vector<8x1xf32>
    %cst_23 = arith.constant 0.000000e+00 : f32
    %31 = vector.broadcast %cst_23 : f32 to vector<8x1xf32>
    %32 = vector.broadcast %30 : vector<8x1xf32> to vector<8x7xf32>
    %33 = arith.subf %25, %32 : vector<8x7xf32>
    %34 = arith.mulf %33, %33 : vector<8x7xf32>
    %cst_24 = arith.constant dense<0.000000e+00> : vector<8xf32>
    %35 = vector.multi_reduction <add>, %34, %cst_24 [1] : vector<8x7xf32> to vector<8xf32>
    %36 = vector.shape_cast %35 : vector<8xf32> to vector<8x1xf32>
    %37 = arith.addf %31, %36 : vector<8x1xf32>
    %c0_25 = arith.constant 0 : index
    %c0_26 = arith.constant 0 : index
    %c0_27 = arith.constant 0 : index
    %38 = vector.load %arg4[%c0_25, %c0_26, %c0_27] : memref<1x8x1xf32, #tpu.memory_space<vmem>>, vector<1x8x1xf32>
    %39 = vector.shape_cast %38 : vector<1x8x1xf32> to vector<8x1xf32>
    %40 = vector.shape_cast %30 : vector<8x1xf32> to vector<1x8x1xf32>
    tpu.vector_store %arg4[%c0_25, %c0_26, %c0_27], %40 {strides = array<i32>} : memref<1x8x1xf32, #tpu.memory_space<vmem>>, vector<1x8x1xf32>,
    %c0_28 = arith.constant 0 : index
    %c0_29 = arith.constant 0 : index
    %c0_30 = arith.constant 0 : index
    %41 = vector.load %arg5[%c0_28, %c0_29, %c0_30] : memref<1x8x1xf32, #tpu.memory_space<vmem>>, vector<1x8x1xf32>
    %42 = vector.shape_cast %41 : vector<1x8x1xf32> to vector<8x1xf32>
    %43 = vector.shape_cast %37 : vector<8x1xf32> to vector<1x8x1xf32>
    tpu.vector_store %arg5[%c0_28, %c0_29, %c0_30], %43 {strides = array<i32>} : memref<1x8x1xf32, #tpu.memory_space<vmem>>, vector<1x8x1xf32>,
    return
  }
  func.func @transform_0(%arg0: i32) -> (i32, i32, i32, i32) {
    %c0_i32 = arith.constant 0 : i32
    %c0_i32_0 = arith.constant 0 : i32
    %c0_i32_1 = arith.constant 0 : i32
    %c0_i32_2 = arith.constant 0 : i32
    return %arg0, %c0_i32, %c0_i32_0, %c0_i32_1 : i32, i32, i32, i32
  }
  func.func @transform_1(%arg0: i32) -> (i32, i32, i32) {
    %c0_i32 = arith.constant 0 : i32
    %c0_i32_0 = arith.constant 0 : i32
    %c0_i32_1 = arith.constant 0 : i32
    %c0_i32_2 = arith.constant 0 : i32
    return %c0_i32, %c0_i32_0, %c0_i32_1 : i32, i32, i32
  }
  func.func @transform_2(%arg0: i32) -> (i32, i32) {
    %c0_i32 = arith.constant 0 : i32
    %c0_i32_0 = arith.constant 0 : i32
    %c0_i32_1 = arith.constant 0 : i32
    return %c0_i32, %c0_i32_0 : i32, i32
  }
  func.func @transform_3(%arg0: i32) -> (i32, i32, i32) {
    %c0_i32 = arith.constant 0 : i32
    %c0_i32_0 = arith.constant 0 : i32
    %c0_i32_1 = arith.constant 0 : i32
    return %arg0, %c0_i32, %c0_i32_0 : i32, i32, i32
  }
  func.func @transform_4(%arg0: i32) -> (i32, i32, i32) {
    %c0_i32 = arith.constant 0 : i32
    %c0_i32_0 = arith.constant 0 : i32
    %c0_i32_1 = arith.constant 0 : i32
    return %arg0, %c0_i32, %c0_i32_0 : i32, i32, i32
  }
}

</mosaic_0001>

<bundles_post_ra>
// kernel: relu_renorm_layer.2
= control target key start
LH: loop header
LB: loop body
LE: loop exit
PB: predicated region body
PF: predicated region fallthrough
CT: control target
= control target key end

     0   :  { %s646_s15 = smov 0   ;;  %s692_s0 = inlined_call_operand.vmem [shape: f32[2,2,4,8], index: 0, kind: input, shape index: {}]   ;;  %s693_s1 = inlined_call_operand.vmem [shape: f32[3,8,4], index: 1, kind: input, shape index: {}]   ;;  %s694_s2 = inlined_call_operand.vmem [shape: f32[8,1], index: 2, kind: input, shape index: {}]   ;;  %s695_s3 = inlined_call_operand.vmem [shape: f32[2,8,1], index: 3, kind: output, shape index: {0}]   ;;  %s696_s4 = inlined_call_operand.vmem [shape: f32[2,8,1], index: 4, kind: output, shape index: {1}]  }
   0x1 LB: > { %s554_s16 = sadd.s32 4294967295, %s615_s15   ;;  %p558_p0 = scmp.ge.s32.totalorder %s615_s15, 1  ;;  %s615_s15 = sphi %s646_s15, %s15_s15  }
   0x2   : > { %p165_p1 = scmp.lt.s32.totalorder %s615_s15, 3 }
   0x4   : > { %p166_p2 = pnand %p558_p0, %p165_p1 }
   0x5   : > { %p194_p3 = scmp.lt.s32.totalorder (!%p166_p2), %s554_s16, 1  ;;  %s620_s25 = smov (!%p166_p2), 127  }
   0x6   : > { %169 = sbr.rel (%p166_p2) target bundleno = 615 (0x267), region = 32 }
   0xb   : > { %v617_v0 = vmov 0.0   ;;  %vm618_vm0 = vmmov 0   ;;  %s698_s16 = smov (!%p194_p3, %s554_s16), 1  ;;  %v619_v1 = vmov 0   ;;  %vm220_vm1 = vcmask 1043456   ;;  %v563_v2 = vld [vmem:[%s693_s1 + $0x8] sm:$0xff] }
   0xc   : > { %581 = vmatprep.subr.mxu0 %v617_v0  ;;  %583 = vmatprep.mubr.msk.f32.mxu0 %vm618_vm0, %v617_v0  ;;  %s656_s17 = sshll.u32 %s698_s16, 3  ;;  %vm216_vm2 = vcmask 31744   ;;  %v207_v5 = vld [vmem:[%s693_s1] sm:$0xff]  ;;  %v564_v7 = vld [vmem:[%s693_s1 + $0x10] sm:$0xff]  ;;  %vm455_vm3 = vcmask 56320   ;;  %vm467_vm4 = vcmask 7168  }
   0xd   : > { %586 = vmatprep.subr.mxu1 %v617_v0  ;;  %588 = vmatprep.mubr.msk.f32.mxu1 %vm618_vm0, %v617_v0  ;;  %s198_s20 = scalar_lea.vmem %s692_s0, %s656_s17  ;;  %v212_v6 = vld [vmem:[%s694_s2] sm:$0xff]  ;;  %s202_s6 = scalar_lea.vmem %s695_s3, %s656_s17 }
   0xe   : > { %608 = vset.pattern.permute.xlu0 %v619_v1  ;;  %v213_v3 = vld [vmem:[%s198_s20] sm:$0xf]  ;;  %v565_v4 = vld [vmem:[%s198_s20 + $0x4] sm:$0xf]  ;;  %s206_s9 = scalar_lea.vmem %s696_s4, %s656_s17 }
   0xf   : > { %370 = vrot.lane.b32.xlu0 %v213_v3, %s620_s25  ;;  %582 = vmatpush3.msk.msra.mxu0 %vm220_vm1, %v565_v4 }
  0x10   : > { %584 = vmatmul.mubr.msk.f32.vlgmr.msra.gmra.mxu0 %vm216_vm2, %v563_v2  ;;  %587 = vmatpush3.msk.msra.mxu1 %vm220_vm1, %v213_v3 }
  0x11   : > { %591 = vmatprep.subr.mxu0 %v617_v0  ;;  %589 = vmatmul.mubr.msk.f32.vlgmr.msra.gmra.mxu1 %vm216_vm2, %v207_v5 }
  0x12   : > { %593 = vmatprep.mubr.msk.f32.mxu0 %vm618_vm0, %v617_v0 }
  0x13   : > { %450 = vperm.xlu0 %608, %v212_v6  }
  0x81   : > { %v371_v8 = vpop.permute.xlu0 %370 }
  0x82   : > { %592 = vmatpush3.msk.msra.mxu0 %vm220_vm1, %v371_v8 }
  0x83   : > { %594 = vmatmul.mubr.msk.f32.vlgmr.msra.gmra.mxu0 %vm216_vm2, %v564_v7 }
  0x8e   : > { %v451_v15 = vpop.permute.xlu0 %450 }
  0xd0   : > { %v290_v9 = vpop.f32.mrf.mxu0 }
  0xd1   : > { %v366_v10 = vpop.f32.mrf.mxu1 }
  0xd2   : > { %v585_v11 = vpop.f32.mrf.mxu0  ;;  %v367_v12 = vadd.f32 %v366_v10, %v290_v9 }
  0xd3   : > { %v590_v13 = vpop.f32.mrf.mxu1 }
 0x143   : > { %v443_v14 = vpop.f32.mrf.mxu0 }
 0x144   : > { %v447_v16 = vadd.f32 %v443_v14, %v367_v12 }
 0x145   : > { %v595_v17 = vpop.f32.mrf.mxu0 }
 0x146   : > { %v453_v18 = vadd.f32 %v451_v15, %v447_v16 }
 0x148   : > { %v454_v19 = vmax.f32 %v453_v18, 0.0 }
 0x14a   : > { %v456_v20 = vsel %vm455_vm3, %v454_v19, 0.0 }
 0x14b   : > { %457 = vadd.xlane.f32.xlu1 %v456_v20 }
 0x1d4   : > { %v458_v21 = vpop.xlane.xlu1 %457 }
 0x1d5   : > { %v460_v22 = vmul.f32 0.14285715, %v458_v21 }
 0x1d7   : > { %v461_v23 = vsub.f32 %v454_v19, %v460_v22  ;;  %468 = vst.msk [vmem:[%s202_s6] sm:$0xff] %vm467_vm4, %v460_v22 }
 0x1d9   : > { %v462_v24 = vmul.f32 %v461_v23, %v461_v23 }
 0x1db   : > { %v463_v25 = vsel %vm455_vm3, %v462_v24, 0.0 }
 0x1dc   : > { %464 = vadd.xlane.f32.xlu1 %v463_v25 }
 0x265   : > { %v465_v26 = vpop.xlane.xlu1 %464 }
 0x266   : > { %469 = vst.msk [vmem:[%s206_s9] sm:$0xff] %vm467_vm4, %v465_v26 }
 0x267 PF: > { %s15_s15 = sadd.s32 1, %s615_s15  }
 0x268   : > { %p12_p4 = scmp.ge.s32.totalorder %s15_s15, 4  }
 0x26a   :  { %14 = sbr.rel (!%p12_p4) target bundleno = 1 (0x1), region = 77 }

// kernel: relu_renorm_layer.3
= control target key start
LH: loop header
LB: loop body
LE: loop exit
PB: predicated region body
PF: predicated region fallthrough
CT: control target
= control target key end

     0   :  { %s637_s18 = smov 0   ;;  %s688_s0 = inlined_call_operand.vmem [shape: f32[2,2,4,8], index: 0, kind: input, shape index: {}]   ;;  %s689_s1 = inlined_call_operand.vmem [shape: f32[3,8,4], index: 1, kind: input, shape index: {}]   ;;  %s690_s2 = inlined_call_operand.vmem [shape: f32[8,1], index: 2, kind: input, shape index: {}]   ;;  %s691_s3 = inlined_call_operand.vmem [shape: f32[8,1], index: 3, kind: input, shape index: {}]   ;;  %s692_s4 = inlined_call_operand.vmem [shape: f32[8,1], index: 4, kind: input, shape index: {}]   ;;  %s693_s5 = inlined_call_operand.vmem [shape: f32[2,8,7], index: 5, kind: output, shape index: {}]  }
   0x1 LB: > { %s540_s19 = sadd.s32 4294967295, %s601_s18   ;;  %p544_p0 = scmp.ge.s32.totalorder %s601_s18, 1  ;;  %s601_s18 = sphi %s637_s18, %s15_s18  }
   0x2   : > { %p187_p1 = scmp.lt.s32.totalorder %s601_s18, 3 }
   0x4   : > { %p188_p2 = pnand %p544_p0, %p187_p1 }
   0x5   : > { %p214_p3 = scmp.lt.s32.totalorder (!%p188_p2), %s540_s19, 1  ;;  %s606_s30 = smov (!%p188_p2), 127  }
   0x6   : > { %191 = sbr.rel (%p188_p2) target bundleno = 335 (0x14f), region = 40 }
   0xb   : > { %v603_v0 = vmov 0.0   ;;  %vm604_vm0 = vmmov 0   ;;  %s695_s19 = smov (!%p214_p3, %s540_s19), 1  ;;  %v229_v1 = vld [vmem:[%s691_s3] sm:$0xff]  ;;  %v605_v2 = vmov 0   ;;  %vm238_vm1 = vcmask 1043456  }
   0xc   : > { %566 = vmatprep.subr.mxu0 %v603_v0  ;;  %568 = vmatprep.mubr.msk.f32.mxu0 %vm604_vm0, %v603_v0  ;;  %s559_s22 = sshll.u32 %s695_s19, 3  ;;  %v548_v3 = vld [vmem:[%s689_s1 + $0x8] sm:$0xff]  ;;  %vm234_vm2 = vcmask 31744   ;;  %v223_v6 = vld [vmem:[%s689_s1] sm:$0xff]  ;;  %v549_v9 = vld [vmem:[%s689_s1 + $0x10] sm:$0xff]  ;;  %vm485_vm3 = vcmask 56320  }
   0xd   : > { %571 = vmatprep.subr.mxu1 %v603_v0  ;;  %573 = vmatprep.mubr.msk.f32.mxu1 %vm604_vm0, %v603_v0  ;;  %s218_s25 = scalar_lea.vmem %s688_s0, %s559_s22  ;;  %v230_v7 = vld [vmem:[%s692_s4] sm:$0xff]  ;;  %s222_s14 = scalar_lea.vmem %s693_s5, %s559_s22 }
   0xe   : > { %593 = vset.pattern.permute.xlu0 %v605_v2  ;;  %594 = vset.pattern.permute.xlu1 %v605_v2  ;;  %v231_v4 = vld [vmem:[%s218_s25] sm:$0xf]  ;;  %v550_v5 = vld [vmem:[%s218_s25 + $0x4] sm:$0xf] }
   0xf   : > { %475 = vperm.xlu1 %594, %v229_v1   ;;  %388 = vrot.lane.b32.xlu0 %v231_v4, %s606_s30  ;;  %v228_v8 = vld [vmem:[%s690_s2] sm:$0xff] }
  0x10   : > { %567 = vmatpush3.msk.msra.mxu0 %vm238_vm1, %v550_v5  ;;  %572 = vmatpush3.msk.msra.mxu1 %vm238_vm1, %v231_v4 }
  0x11   : > { %569 = vmatmul.mubr.msk.f32.vlgmr.msra.gmra.mxu0 %vm234_vm2, %v548_v3  ;;  %576 = vmatprep.subr.mxu0 %v603_v0 }
  0x12   : > { %574 = vmatmul.mubr.msk.f32.vlgmr.msra.gmra.mxu1 %vm234_vm2, %v223_v6  ;;  %578 = vmatprep.mubr.msk.f32.mxu0 %vm604_vm0, %v603_v0 }
  0x13   : > { %481 = vperm.xlu1 %594, %v230_v7   ;;  %468 = vperm.xlu0 %593, %v228_v8  }
  0x81   : > { %v389_v10 = vpop.permute.xlu0 %388 }
  0x82   : > { %577 = vmatpush3.msk.msra.mxu0 %vm238_vm1, %v389_v10 }
  0x83   : > { %579 = vmatmul.mubr.msk.f32.vlgmr.msra.gmra.mxu0 %vm234_vm2, %v549_v9 }
  0x8a   : > { %v476_v19 = vpop.permute.xlu1 %475 }
  0x8e   : > { %v469_v17 = vpop.permute.xlu0 %468  ;;  %v482_v24 = vpop.permute.xlu1 %481 }
  0xd1   : > { %v308_v11 = vpop.f32.mrf.mxu0 }
  0xd2   : > { %v384_v12 = vpop.f32.mrf.mxu1 }
  0xd3   : > { %v570_v13 = vpop.f32.mrf.mxu0  ;;  %v385_v14 = vadd.f32 %v384_v12, %v308_v11 }
  0xd4   : > { %v575_v15 = vpop.f32.mrf.mxu1 }
 0x143   : > { %v461_v16 = vpop.f32.mrf.mxu0 }
 0x144   : > { %v465_v18 = vadd.f32 %v461_v16, %v385_v14 }
 0x145   : > { %v580_v20 = vpop.f32.mrf.mxu0 }
 0x146   : > { %v471_v21 = vadd.f32 %v469_v17, %v465_v18 }
 0x148   : > { %v472_v22 = vmax.f32 %v471_v21, 0.0 }
 0x14a   : > { %v478_v23 = vsub.f32 %v472_v22, %v476_v19 }
 0x14c   : > { %v484_v25 = vmul.f32 %v482_v24, %v478_v23 }
 0x14e   : > { %486 = vst.msk [vmem:[%s222_s14] sm:$0xff] %vm485_vm3, %v484_v25 }
 0x14f PF: > { %s15_s18 = sadd.s32 1, %s601_s18  }
 0x150   : > { %p12_p4 = scmp.ge.s32.totalorder %s15_s18, 4  }
 0x152   :  { %14 = sbr.rel (!%p12_p4) target bundleno = 1 (0x1), region = 73 }

</bundles_post_ra>
